<compile_context>
chip_gen: v7x
topology: tpu7x:2x2x1
jax: 0.10.0
libtpu: 0.0.40
codegen_flags: <defaults>
</compile_context>

<pallas_src>
import functools

import jax
import jax.numpy as jnp
from jax.experimental import pallas as pl
from jax.experimental.pallas import tpu as pltpu


def _build_position(seq_len: int, dim_emb: int, base: int = 10000) -> jnp.ndarray:
    """Deterministic buffer init matching the PyTorch __init__ (plain-JAX glue)."""
    assert dim_emb % 2 == 0, "dim_emb must be even (interleaved sin/cos pairs)"
    indices = jnp.arange(0, seq_len, dtype=jnp.float32)                                 # (S,)
    scale = 1.0 / base ** (jnp.arange(0, dim_emb, 2, dtype=jnp.float32) / dim_emb)      # (D/2,)
    angles = indices[:, None] * scale[None, :]                                          # (S, D/2)
    pos = jnp.zeros((seq_len, dim_emb), dtype=jnp.float32)
    pos = pos.at[:, 0::2].set(jnp.sin(angles))
    pos = pos.at[:, 1::2].set(jnp.cos(angles))
    return pos  # (S, D)


def _add_pos_kernel(x_ref, pos_ref, o_ref, *, compute_dtype):
    # x_ref: (TM, TN) block; pos_ref: (1, TN) block broadcast over the flattened row axis.
    x = x_ref[...].astype(compute_dtype)
    p = pos_ref[...].astype(compute_dtype)
    o_ref[...] = (x + p).astype(o_ref.dtype)


def _round_up(n: int, m: int) -> int:
    return ((n + m - 1) // m) * m


def cosine_positional_encoding(
    x: jnp.ndarray,
    pos: jnp.ndarray,
    *,
    force_pallas: bool = False,
    min_pallas_elems: int = 1 << 15,
    compute_dtype=None,
    block_budget_bytes: int = 4 * 1024 * 1024,
) -> jnp.ndarray:
    """x: (..., S, D); pos: (S, D) float32. Returns x + pos broadcast over leading dims."""
    *lead, S, D = x.shape
    assert pos.shape == (S, D)

    if compute_dtype is None:
        # f32 compute is safe everywhere (v5e has no bf16 VPU); no-op for f32 inputs.
        compute_dtype = x.dtype if x.dtype == jnp.float32 else jnp.float32

    # Tiny problems: let XLA fuse a plain add with neighboring ops instead of paying
    # kernel-launch + per-grid-step overhead.
    if not force_pallas and x.size < min_pallas_elems:
        return (x.astype(compute_dtype) + pos.astype(compute_dtype)).astype(x.dtype)

    rows = 1
    for d in lead:
        rows *= d
    cols = S * D
    x2 = x.reshape(rows, cols)                 # lane-dense 2D view
    pos2 = pos.reshape(1, cols)                # broadcast over rows (kept f32)

    itemsize = jnp.dtype(x.dtype).itemsize
    sublane_mult = {4: 8, 2: 16, 1: 32}.get(itemsize, 8)

    # --- Lane (last-dim) tile: constant ~8 KiB of lanes per row-chunk, multiple of 128
    # (or full extent).  Ragged columns fall back to a multiple-of-128 tile with a masked
    # edge block rather than a pathological divisor or an oversized full-extent block.
    lane_cap = max(128, 8192 // itemsize)      # 2048 f32 / 4096 bf16 / 8192 int8
    if cols % 128 == 0:
        tn = min(lane_cap, cols)
    elif cols < 128:
        tn = cols                               # full-extent block: always legal
    else:
        tn = min(lane_cap, (cols // 128) * 128)  # multiple of 128; cdiv masks the edge

    # --- Row tile: byte budget (~4 MiB per block), multiple of sublane_mult or full extent.
    row_budget = max(sublane_mult, block_budget_bytes // max(1, tn * itemsize))
    tm_cap = max(sublane_mult, (row_budget // sublane_mult) * sublane_mult)
    tm = rows if rows <= tm_cap else tm_cap

    n_col = pl.cdiv(cols, tn)
    n_row = pl.cdiv(rows, tm)

    # v7x has two TensorCores: make sure the ("parallel","parallel") grid has >= 2 tiles
    # so mid-size shapes don't run entirely on one core.  Costs nothing on v5e/v6e.
    if n_col * n_row == 1:
        if rows >= 2 * sublane_mult:
            tm = _round_up(pl.cdiv(rows, 2), sublane_mult)
            n_row = pl.cdiv(rows, tm)
        elif cols >= 2 * 128:
            tn = _round_up(pl.cdiv(cols, 2), 128)
            n_col = pl.cdiv(cols, tn)

    kernel = functools.partial(_add_pos_kernel, compute_dtype=compute_dtype)

    out = pl.pallas_call(
        kernel,
        out_shape=jax.ShapeDtypeStruct((rows, cols), x.dtype),
        grid_spec=pltpu.PrefetchScalarGridSpec(
            num_scalar_prefetch=0,
            # Column axis outermost: pos's block index is constant across the inner row
            # loop, so its block stays resident in VMEM (no re-DMA per leading-dim step).
            grid=(n_col, n_row),
            in_specs=[
                pl.BlockSpec((tm, tn), lambda j, i: (i, j)),
                pl.BlockSpec((1, tn), lambda j, i: (0, j)),
            ],
            out_specs=pl.BlockSpec((tm, tn), lambda j, i: (i, j)),
        ),
        compiler_params=pltpu.CompilerParams(
            dimension_semantics=("parallel", "parallel"),
            vmem_limit_bytes=32 * 1024 * 1024,
        ),
        # Write the output in place when the caller donates x (free footprint win).
        input_output_aliases={0: 0},
    )(x2, pos2)

    # TODO(synk): if xprof ever shows exposed DMA for tiny-row shapes, try
    # pipeline_mode=pl.Buffered(3) on the x/out specs (measure first).
    return out.reshape(x.shape)


if __name__ == "__main__":
    key = jax.random.PRNGKey(0)
    k1, k2, k3, k4 = jax.random.split(key, 4)

    # Case 1: small shape consistent with the module: x (2, 4, 8, 32) + pos (8, 32).
    B, H, S, D = 2, 4, 8, 32
    x = jax.random.normal(k1, (B, H, S, D), dtype=jnp.float32)
    pos = _build_position(S, D)
    y_ref = x + pos[None, None, :, :]
    y = cosine_positional_encoding(x, pos, force_pallas=True)
    jax.block_until_ready(y)
    assert y.shape == x.shape and y.dtype == x.dtype
    assert jnp.allclose(y, y_ref, atol=1e-6), "mismatch vs reference (small case)"

    # Case 2: exercises the wide lane-tile path (cols = 8192 -> tn = 2048, 4 column tiles).
    B2, H2, S2, D2 = 2, 4, 64, 128
    x2 = jax.random.normal(k2, (B2, H2, S2, D2), dtype=jnp.float32)
    pos2 = _build_position(S2, D2)
    y2_ref = x2 + pos2[None, None, :, :]
    y2 = cosine_positional_encoding(x2, pos2, force_pallas=True)
    jax.block_until_ready(y2)
    assert jnp.allclose(y2, y2_ref, atol=1e-6), "mismatch vs reference (tiled case)"

    # Case 3: ragged columns + 3D input (rows = 3, cols = 960 -> masked edge column block).
    B3, S3, D3 = 3, 10, 96
    x3 = jax.random.normal(k3, (B3, S3, D3), dtype=jnp.float32)
    pos3 = _build_position(S3, D3)
    y3_ref = x3 + pos3[None, :, :]
    y3 = cosine_positional_encoding(x3, pos3, force_pallas=True)
    jax.block_until_ready(y3)
    assert jnp.allclose(y3, y3_ref, atol=1e-6), "mismatch vs reference (ragged case)"

    # Case 4: bf16 input (default safe f32 compute path).
    x4 = jax.random.normal(k4, (B, H, S, D), dtype=jnp.float32).astype(jnp.bfloat16)
    y4_ref = (x4.astype(jnp.float32) + pos[None, None, :, :]).astype(jnp.bfloat16)
    y4 = cosine_positional_encoding(x4, pos, force_pallas=True)
    jax.block_until_ready(y4)
    assert y4.dtype == jnp.bfloat16
    assert jnp.allclose(y4.astype(jnp.float32), y4_ref.astype(jnp.float32), atol=1e-6), \
        "mismatch vs reference (bf16 case)"

    print("KERNEL_OK")
</pallas_src>

<mosaic_0001>
module attributes {stable_mosaic.version = 11 : i64} {
  func.func @_add_pos_kernel(%arg0: i32, %arg1: i32, %arg2: memref<8x128xf32, #tpu.memory_space<vmem>>, %arg3: memref<1x128xf32, #tpu.memory_space<vmem>>, %arg4: memref<8x128xf32, #tpu.memory_space<vmem>>) attributes {dimension_semantics = [#tpu.dimension_semantics<parallel>, #tpu.dimension_semantics<parallel>], iteration_bounds = array<i64: 2, 1>, scalar_prefetch = 0 : i64, scratch_operands = 0 : i64, tpu.core_type = #tpu.core_type<tc>, window_params = [{transform_indices = @transform_0, window_bounds = array<i64: 8, 128>}, {transform_indices = @transform_1, window_bounds = array<i64: 1, 128>}, {transform_indices = @transform_2, window_bounds = array<i64: 8, 128>}]} {
    %c0 = arith.constant 0 : index
    %c0_0 = arith.constant 0 : index
    %0 = vector.load %arg2[%c0, %c0_0] : memref<8x128xf32, #tpu.memory_space<vmem>>, vector<8x128xf32>
    %c0_1 = arith.constant 0 : index
    %c0_2 = arith.constant 0 : index
    %1 = vector.load %arg3[%c0_1, %c0_2] : memref<1x128xf32, #tpu.memory_space<vmem>>, vector<1x128xf32>
    %2 = vector.broadcast %1 : vector<1x128xf32> to vector<8x128xf32>
    %3 = arith.addf %0, %2 : vector<8x128xf32>
    %c0_3 = arith.constant 0 : index
    %c0_4 = arith.constant 0 : index
    %4 = vector.load %arg4[%c0_3, %c0_4] : memref<8x128xf32, #tpu.memory_space<vmem>>, vector<8x128xf32>
    tpu.vector_store %arg4[%c0_3, %c0_4], %3 {strides = array<i32>} : memref<8x128xf32, #tpu.memory_space<vmem>>, vector<8x128xf32>,
    return
  }
  func.func @transform_0(%arg0: i32, %arg1: i32) -> (i32, i32) {
    %c0_i32 = arith.constant 0 : i32
    return %arg1, %arg0 : i32, i32
  }
  func.func @transform_1(%arg0: i32, %arg1: i32) -> (i32, i32) {
    %c0_i32 = arith.constant 0 : i32
    %c0_i32_0 = arith.constant 0 : i32
    return %c0_i32, %arg0 : i32, i32
  }
  func.func @transform_2(%arg0: i32, %arg1: i32) -> (i32, i32) {
    %c0_i32 = arith.constant 0 : i32
    return %arg1, %arg0 : i32, i32
  }
}

</mosaic_0001>

<bundles_post_ra>
// kernel: tpu_custom_call.1
= control target key start
LH: loop header
LB: loop body
LE: loop exit
PB: predicated region body
PF: predicated region fallthrough
CT: control target
= control target key end

     0   :  { %7 = vsyncpa [#allocation3], 0  ;;  %s692_s0 = inlined_call_operand.hbm [shape: f32[8,256], index: 0, kind: input, shape index: {}, may-alias: {0,2}]   ;;  %s693_s1 = inlined_call_operand.vmem [shape: f32[1,256], index: 1, kind: input, shape index: {}]   ;;  %s694_s2 = inlined_call_operand.hbm [shape: f32[8,256], index: 2, kind: output, shape index: {}, may-alias: {0,2}]  }
   0x1   :  { %9 = vsyncpa [#allocation3 + $0x1], 0 }
   0x2   :  { %10 = vsyncpa [#allocation4], 0 }
   0x3   :  { %12 = vsyncpa [#allocation4 + $0x1], 0  ;;  %s515_s9 = smov 0   ;;  %s517_s10 = smov 0  }
   0x4   :  { %s519_s11 = smov 0   ;;  %s521_s12 = smov 0  }
   0x5   :  { %s523_s13 = smov 0   ;;  %s525_s14 = smov 0  }
   0x6 LB: > { %s308_s15 = sadd.s32 4294967295, %s496_s14   ;;  %s309_s16 = sadd.s32 4294967294, %s496_s14   ;;  %s496_s14 = sphi %s525_s14, %s18_s14   ;;  %s492_s13 = sphi %s523_s13, %s710_s13   ;;  %s488_s12 = sphi %s521_s12, %s709_s12   ;;  %s484_s11 = sphi %s519_s11, %s708_s11   ;;  %s480_s10 = sphi %s517_s10, %s707_s10   ;;  %s476_s9 = sphi %s515_s9, %s706_s9  }
   0x7   : > { %s30_s17 = sadd.s32 1, %s492_s13  ;;  %s39_s18 = sadd.s32 1, %s484_s11 }
   0x8   : > { %p32_p0 = scmp.ge.s32.totalorder %s30_s17, 2  ;;  %p46_p1 = scmp.ne.s32.totalorder %s484_s11, %s480_s10 }
   0x9   : > { %p47_p2 = scmp.eq.s32.totalorder %s496_s14, 0  ;;  %p52_p3 = scmp.ne.s32.totalorder %s480_s10, %s476_s9 }
   0xa   : > { %s712_s17 = smov (%p32_p0, %s30_s17), 0  ;;  %p53_p5 = scmp.eq.s32.totalorder %s308_s15, 0 }
   0xb   : > { %p556_p4 = por %p47_p2, %p46_p1  ;;  %s35_s20 = ssub.s32 %s492_s13, %s712_s17 }
   0xc   : > { %p104_p6 = scmp.eq.s32.totalorder %s308_s15, 1  ;;  %p37_p7 = scmp.eq.s32.totalorder %s35_s20, 0 }
   0xd   : > { %p562_p8 = por %p53_p5, %p52_p3  ;;  %p110_p10 = scmp.eq.s32.totalorder %s309_s16, 1 }
   0xe   : > { %p566_p9 = por %p104_p6, %p46_p1  ;;  %p334_p13 = scmp.lt.s32.totalorder %s496_s14, 2 }
   0xf   : > { %s571_s23 = scalar_select %p37_p7, %s484_s11, %s39_s18  }
  0x10   : > { %s698_s22 = scalar_select %p566_p9, 1, 0 }
  0x11   : > { %p573_p11 = por %p110_p10, %p52_p3  ;;  %s130_s25 = sand.u32 1, %s484_s11  }
  0x12   : > { %s312_s26 = sshll.u32 %s130_s25, 3  ;;  %s313_s27 = sshll.u32 %s492_s13, 7 }
  0x13   : > { %s699_s24 = scalar_select %p573_p11, 1, 0 }
  0x14   : > { %s584_s30 = scalar_lea.hbm %s692_s0, %s313_s27  ;;  %s134_s3 = scalar_lea.vmem [#allocation2], %s312_s26 }
  0x15   : > { %s143_s4 = sshll.u32 %s134_s3, 4  ;;  %p590_p0 = pnand %p334_p13, %p556_p4  ;;  %s586_s4 = int_to_ptr.vmem [resolvable:$true] %s143_s4 }
  0x16   : > { %s131_s6 = scalar_lea.sflag [#allocation3], %s130_s25  ;;  %s384_s7 = scalar_lea.hbm %s584_s30, 128 }
  0x17   : > { %p385_p3 = scmp.ne.s32.totalorder %s584_s30, %s384_s7  ;;  %p386_p5 = pneg %p590_p0 }
  0x18   : > { %s389_s16 = scalar_lea.hbm %s692_s0, 256  ;;  %p390_p4 = scmp.lt.u32.totalorder %s584_s30, %s692_s0 }
  0x19   : > { %p387_p6 = pnand %p386_p5, %p385_p3  ;;  %p391_p10 = scmp.lt.u32.totalorder %s389_s16, %s384_s7 }
  0x1a   : > { %p393_p12 = scmp.lt.u32.totalorder %s384_s7, %s584_s30 }
  0x1b   : > { %p388_p7 = pneg %p387_p6  ;;  %p392_p13 = por %p391_p10, %p390_p4 }
  0x1d   : > { %p394_p1 = por %p393_p12, %p392_p13 }
  0x1f   : > { %p395_p2 = pnand %p394_p1, %p388_p7 }
  0x21   : > { %398 = shalt.err (!%p395_p2)
}
  0x22   : > { %s399_s20 = scalar_lea.vmem %s586_s4, 128  ;;  %s498_s25 = smov [#allocation2]  }
  0x23   : > { %p400_p3 = scmp.ne.s32.totalorder %s586_s4, %s399_s20  ;;  %s404_s26 = sshll.u32 %s498_s25, 4  ;;  %s405_s26 = int_to_ptr.vmem [resolvable:$false] %s404_s26 }
  0x24   : > { %s406_s27 = scalar_lea.vmem %s405_s26, 256  ;;  %p407_p9 = scmp.lt.s32.totalorder %s586_s4, %s405_s26 }
  0x25   : > { %p402_p6 = pnand %p400_p3, %p386_p5  ;;  %p408_p4 = scmp.lt.s32.totalorder %s406_s27, %s399_s20 }
  0x27   : > { %p403_p11 = pneg %p402_p6  ;;  %p409_p10 = por %p408_p4, %p407_p9 }
  0x29   : > { %p410_p12 = pnand %p409_p10, %p403_p11 }
  0x2b   : > { %413 = shalt.err (!%p410_p12)
}
  0x2c   : > { %329 = dma.hbm_to_vmem [thread:$0]  (!%p590_p0), %s584_s30, 128, %s586_s4, %s131_s6  }
  0x2d   : > { %p701_p1 = scmp.lt.s32.totalorder %s496_s14, 3  ;;  %p702_p2 = scmp.ge.s32.totalorder %s496_s14, 1 }
  0x2f   : > { %p155_p5 = pnand %p702_p2, %p701_p1 }
  0x30   : > { %s626_s28 = sand.u32 (!%p155_p5), 1, %s480_s10  }
  0x31   : > { %158 = sbr.rel (%p155_p5) target bundleno = 85 (0x55), region = 28  ;;  %s315_s29 = sshll.u32 (!%p155_p5), %s626_s28, 3 }
  0x32   : > { %s161_s3 = scalar_lea.sflag (!%p155_p5), [#allocation3], %s626_s28  ;;  %s164_s7 = scalar_lea.vmem (!%p155_p5), [#allocation2], %s315_s29 }
  0x38   : > { %467 = dma.done.wait (%p562_p8), %s161_s3, 128  }
  0x39   : > { %469 = vsyncadd (%p562_p8), %s161_s3, 4294967168  ;;  %p188_p9 = scmp.lt.s32.totalorder %s488_s12, 1  ;;  %s187_s8 = scalar_lea.vmem [#allocation5], %s315_s29  ;;  %v191_v0 = vld [vmem:[%s164_s7] sm:$0xff] }
  0x3a   : > { %s217_s15 = sshll.u32 %s187_s8, 4  ;;  %s319_s16 = sshll.u32 %s488_s12, 7  ;;  %s640_s15 = int_to_ptr.vmem [resolvable:$true] %s217_s15 }
  0x3b   : > { %s189_s30 = scalar_select %p188_p9, %s488_s12, 1 }
  0x3c   : > { %s645_s19 = scalar_lea.hbm %s694_s2, %s319_s16  ;;  %s202_s20 = scalar_lea.sflag [#allocation4], %s626_s28 }
  0x3d   : > { %s190_s6 = scalar_lea.vmem %s693_s1, %s189_s30  ;;  %s414_s25 = scalar_lea.vmem %s640_s15, 128 }
  0x3e   : > { %v317_v1 = vld [vmem:[%s190_s6] ss:$0 sm:$0xff]  ;;  %p415_p8 = scmp.ne.s32.totalorder %s640_s15, %s414_s25  ;;  %p703_p11 = scmp.ne.s32.totalorder %s698_s22, 0 }
  0x3f   : > { %v199_v2 = vadd.f32 %v317_v1, %v191_v0  ;;  %s499_s12 = smov [#allocation5]  }
  0x40   : > { %p416_p0 = pnand %p415_p8, %p703_p11  ;;  %s418_s26 = sshll.u32 %s499_s12, 4  ;;  %s419_s26 = int_to_ptr.vmem [resolvable:$false] %s418_s26 }
  0x41   : > { %200 = vst [vmem:[%s187_s8] sm:$0xff] %v199_v2  ;;  %s420_s27 = scalar_lea.vmem %s419_s26, 256  ;;  %p421_p13 = scmp.lt.s32.totalorder %s640_s15, %s419_s26 }
  0x42   : > { %p417_p7 = pneg %p416_p0  ;;  %p422_p3 = scmp.lt.s32.totalorder %s420_s27, %s414_s25 }
  0x44   : > { %p423_p6 = por %p422_p3, %p421_p13 }
  0x46   : > { %p424_p4 = pnand %p423_p6, %p417_p7 }
  0x48   : > { %427 = shalt.err (!%p424_p4)
}
  0x49   : > { %s428_s28 = scalar_lea.hbm %s645_s19, 128  ;;  %s432_s7 = scalar_lea.hbm %s694_s2, 256 }
  0x4a   : > { %p429_p10 = scmp.ne.s32.totalorder %s645_s19, %s428_s28  ;;  %p433_p2 = scmp.lt.u32.totalorder %s645_s19, %s694_s2 }
  0x4b   : > { %p434_p5 = scmp.lt.u32.totalorder %s432_s7, %s428_s28  ;;  %p436_p8 = scmp.lt.u32.totalorder %s428_s28, %s645_s19 }
  0x4c   : > { %p430_p12 = pnand %p429_p10, %p703_p11 }
  0x4d   : > { %p435_p9 = por %p434_p5, %p433_p2 }
  0x4e   : > { %p431_p1 = pneg %p430_p12 }
  0x4f   : > { %p437_p0 = por %p436_p8, %p435_p9 }
  0x51   : > { %p438_p7 = pnand %p437_p0, %p431_p1 }
  0x53   : > { %441 = shalt.err (!%p438_p7)
}
  0x54   : > { %324 = dma.vmem_to_hbm [thread:$0]  (%p703_p11), %s640_s15, 128, %s645_s19, %s202_s20  }
  0x55 PF: > { %s229_s5 = sand.u32 1, %s476_s9   ;;  %p704_p13 = scmp.ne.s32.totalorder %s699_s24, 0 }
  0x56   : > { %p705_p3 = scmp.ge.s32.totalorder %s496_s14, 2  ;;  %s230_s6 = scalar_lea.sflag [#allocation4], %s229_s5 }
  0x58   : > { %p331_p6 = pnand %p705_p3, %p704_p13 }
  0x5a   : > { %471 = dma.done.wait (!%p331_p6), %s230_s6, 128  }
  0x5b   : > { %473 = vsyncadd (!%p331_p6), %s230_s6, 4294967168  ;;  %s18_s14 = sadd.s32 1, %s496_s14   ;;  %s706_s9 = smov %s480_s10 }
  0x5c   : > { %p15_p4 = scmp.ge.s32.totalorder %s18_s14, 4   ;;  %s707_s10 = smov %s484_s11 }
  0x5d   : > { %s708_s11 = smov %s571_s23  ;;  %s709_s12 = smov %s492_s13 }
  0x5e   : > { %s710_s13 = smov %s712_s17  ;;  %17 = sbr.rel (!%p15_p4) target bundleno = 6 (0x6), region = 76 }
  0x65   :  { %235 = vsyncpa [#allocation3], 1 }
  0x66   :  { %237 = vsyncpa [#allocation3 + $0x1], 1 }
  0x67   :  { %238 = vsyncpa [#allocation4], 1 }
  0x68   :  { %240 = vsyncpa [#allocation4 + $0x1], 1 }

</bundles_post_ra>
